<compile_context>
chip_gen: v7x
topology: tpu7x:2x2x1
jax: 0.10.0
libtpu: 0.0.40
codegen_flags: <defaults>
</compile_context>

<pallas_src>
import functools

import jax
import jax.numpy as jnp
from jax.experimental import pallas as pl
from jax.experimental.pallas import tpu as pltpu

_LANE = 128
_DEFAULT_TILE_B = 32768  # lanes per grid step; ~1 MiB/buffer -> fits all gens


def _rgb_uncertainty_kernel(pred_ref, tgt_ref, beta_ref, res_ref,
                            wsum_ref, lsum_ref, *, use_l1: bool, batch: int):
    """pred/tgt: (3, TILE_B), beta: (1, TILE_B), res: (1, 1) f32.

    wsum_ref / lsum_ref are (1, 1) f32 VMEM scratch accumulators that persist
    across the grid (reduction axis marked 'arbitrary')."""
    step = pl.program_id(0)

    @pl.when(step == 0)
    def _init():
        wsum_ref[...] = jnp.zeros_like(wsum_ref)
        lsum_ref[...] = jnp.zeros_like(lsum_ref)

    preds = pred_ref[...].astype(jnp.float32)     # (3, TILE_B) lane-dense
    tgts = tgt_ref[...].astype(jnp.float32)       # (3, TILE_B)
    betas = beta_ref[...].astype(jnp.float32)     # (1, TILE_B)

    diff = preds - tgts
    if use_l1:
        err = jnp.abs(diff)                       # L1Loss(reduction='none')
    else:
        err = diff * diff                         # MSELoss(reduction='none')

    # channel sum: 3-row sublane reduction -> (1, TILE_B); /3 deferred to end.
    ch_sum = jnp.sum(err, axis=0, keepdims=True)
    # beta weighting: multiply by exact reciprocal (pure VPU mul afterwards).
    weighted = ch_sum * pl.reciprocal(betas)      # (1, TILE_B)

    # partial sums for this tile (padded cols have err=0 and beta=1 -> add 0).
    wsum_ref[...] += jnp.sum(weighted, axis=1, keepdims=True)
    lsum_ref[...] += jnp.sum(jnp.log(betas), axis=1, keepdims=True)

    @pl.when(step == pl.num_programs(0) - 1)
    def _finalize():
        inv_b = 1.0 / float(batch)
        res_ref[...] = (wsum_ref[...] * (inv_b / 3.0)
                        + lsum_ref[...] * inv_b).astype(res_ref.dtype)


def rgb_with_uncertainty(outputs, targets, betas, *, use_l1: bool = False,
                         tile_b: int = _DEFAULT_TILE_B):
    """outputs: (B, 3), targets: (B, 3), betas: (B,). Returns scalar f32."""
    B = outputs.shape[0]

    # channels-major, lane-dense presentation (wrapper-side layout plumbing).
    preds_t = jnp.transpose(outputs)              # (3, B)
    tgts_t = jnp.transpose(targets)               # (3, B)
    betas_r = betas.astype(jnp.float32).reshape(1, B)

    # pad B up to a lane/tile multiple with neutral rows (err=0, beta=1).
    b_aligned = ((B + _LANE - 1) // _LANE) * _LANE
    tb = min(tile_b, b_aligned)
    n_steps = pl.cdiv(B, tb)
    b_padded = n_steps * tb
    pad = b_padded - B
    if pad:
        preds_t = jnp.pad(preds_t, ((0, 0), (0, pad)))
        tgts_t = jnp.pad(tgts_t, ((0, 0), (0, pad)))
        betas_r = jnp.pad(betas_r, ((0, 0), (0, pad)), constant_values=1.0)

    kernel = functools.partial(_rgb_uncertainty_kernel,
                               use_l1=use_l1, batch=B)

    res = pl.pallas_call(
        kernel,
        out_shape=jax.ShapeDtypeStruct((1, 1), jnp.float32),
        grid_spec=pltpu.PrefetchScalarGridSpec(
            num_scalar_prefetch=0,
            grid=(n_steps,),
            in_specs=[
                pl.BlockSpec((3, tb), lambda i: (0, i)),
                pl.BlockSpec((3, tb), lambda i: (0, i)),
                pl.BlockSpec((1, tb), lambda i: (0, i)),
            ],
            out_specs=pl.BlockSpec((1, 1), lambda i: (0, 0)),
            scratch_shapes=[
                pltpu.VMEM((1, 1), jnp.float32),   # sum of weighted error
                pltpu.VMEM((1, 1), jnp.float32),   # sum of log(beta)
            ],
        ),
        compiler_params=pltpu.CompilerParams(
            dimension_semantics=("arbitrary",),
        ),
    )(preds_t, tgts_t, betas_r)
    return res[0, 0]


def _reference(outputs, targets, betas, *, use_l1: bool = False):
    diff = outputs.astype(jnp.float32) - targets.astype(jnp.float32)
    err = jnp.abs(diff) if use_l1 else diff * diff
    weighted = jnp.mean(err, axis=-1) / betas.astype(jnp.float32)
    return jnp.mean(weighted) + jnp.mean(jnp.log(betas.astype(jnp.float32)))


if __name__ == "__main__":
    key = jax.random.PRNGKey(0)

    # --- case 1: module-sized demo (B=16 rays, RGB), single grid step -------
    k1, k2, k3, k4, k5, k6 = jax.random.split(key, 6)
    B = 16
    outputs = jax.random.normal(k1, (B, 3), dtype=jnp.float32)
    targets = jax.random.normal(k2, (B, 3), dtype=jnp.float32)
    betas = jax.random.uniform(k3, (B,), dtype=jnp.float32,
                               minval=0.1, maxval=2.0)
    use_l1 = False  # conf.get_bool('use_l1') -> default MSE branch

    loss = rgb_with_uncertainty(outputs, targets, betas, use_l1=use_l1)
    jax.block_until_ready(loss)
    ref = _reference(outputs, targets, betas, use_l1=use_l1)
    assert jnp.allclose(loss, ref, rtol=1e-5, atol=1e-5), (loss, ref)

    # --- case 2: multi-step grid path (exercises the resident accumulator) --
    B2 = 300
    outputs2 = jax.random.normal(k4, (B2, 3), dtype=jnp.float32)
    targets2 = jax.random.normal(k5, (B2, 3), dtype=jnp.float32)
    betas2 = jax.random.uniform(k6, (B2,), dtype=jnp.float32,
                                minval=0.1, maxval=2.0)
    loss2 = rgb_with_uncertainty(outputs2, targets2, betas2,
                                 use_l1=use_l1, tile_b=128)
    jax.block_until_ready(loss2)
    ref2 = _reference(outputs2, targets2, betas2, use_l1=use_l1)
    assert jnp.allclose(loss2, ref2, rtol=1e-5, atol=1e-5), (loss2, ref2)

    print("KERNEL_OK")
</pallas_src>

<mosaic_0001>
module attributes {stable_mosaic.version = 11 : i64} {
  func.func @_rgb_uncertainty_kernel(%arg0: i32, %arg1: memref<3x128xf32, #tpu.memory_space<vmem>>, %arg2: memref<3x128xf32, #tpu.memory_space<vmem>>, %arg3: memref<1x128xf32, #tpu.memory_space<vmem>>, %arg4: memref<1x1xf32, #tpu.memory_space<vmem>>, %arg5: memref<1x1xf32, #tpu.memory_space<vmem>>, %arg6: memref<1x1xf32, #tpu.memory_space<vmem>>) attributes {dimension_semantics = [#tpu.dimension_semantics<arbitrary>], iteration_bounds = array<i64: 1>, scalar_prefetch = 0 : i64, scratch_operands = 2 : i64, tpu.core_type = #tpu.core_type<tc>, window_params = [{transform_indices = @transform_0, window_bounds = array<i64: 3, 128>}, {transform_indices = @transform_1, window_bounds = array<i64: 3, 128>}, {transform_indices = @transform_2, window_bounds = array<i64: 1, 128>}, {pipeline_mode = #tpu.pipeline_mode<synchronous>, transform_indices = @transform_3, window_bounds = array<i64: 1, 1>}]} {
    %c0_i32 = arith.constant 0 : i32
    %0 = arith.cmpi eq, %arg0, %c0_i32 : i32
    %1 = arith.extui %0 : i1 to i32
    %c0_i32_0 = arith.constant 0 : i32
    %2 = arith.cmpi ne, %1, %c0_i32_0 : i32
    scf.if %2 {
      %cst_18 = arith.constant 0.000000e+00 : f32
      %26 = vector.broadcast %cst_18 : f32 to vector<1x1xf32>
      %c0_19 = arith.constant 0 : index
      %c0_20 = arith.constant 0 : index
      %27 = vector.load %arg5[%c0_19, %c0_20] : memref<1x1xf32, #tpu.memory_space<vmem>>, vector<1x1xf32>
      tpu.vector_store %arg5[%c0_19, %c0_20], %26 {strides = array<i32>} : memref<1x1xf32, #tpu.memory_space<vmem>>, vector<1x1xf32>,
      %cst_21 = arith.constant 0.000000e+00 : f32
      %28 = vector.broadcast %cst_21 : f32 to vector<1x1xf32>
      %c0_22 = arith.constant 0 : index
      %c0_23 = arith.constant 0 : index
      %29 = vector.load %arg6[%c0_22, %c0_23] : memref<1x1xf32, #tpu.memory_space<vmem>>, vector<1x1xf32>
      tpu.vector_store %arg6[%c0_22, %c0_23], %28 {strides = array<i32>} : memref<1x1xf32, #tpu.memory_space<vmem>>, vector<1x1xf32>,
    } else {
    }
    %c0 = arith.constant 0 : index
    %c0_1 = arith.constant 0 : index
    %3 = vector.load %arg1[%c0, %c0_1] : memref<3x128xf32, #tpu.memory_space<vmem>>, vector<3x128xf32>
    %c0_2 = arith.constant 0 : index
    %c0_3 = arith.constant 0 : index
    %4 = vector.load %arg2[%c0_2, %c0_3] : memref<3x128xf32, #tpu.memory_space<vmem>>, vector<3x128xf32>
    %c0_4 = arith.constant 0 : index
    %c0_5 = arith.constant 0 : index
    %5 = vector.load %arg3[%c0_4, %c0_5] : memref<1x128xf32, #tpu.memory_space<vmem>>, vector<1x128xf32>
    %6 = arith.subf %3, %4 : vector<3x128xf32>
    %7 = arith.mulf %6, %6 : vector<3x128xf32>
    %cst = arith.constant dense<0.000000e+00> : vector<128xf32>
    %8 = vector.multi_reduction <add>, %7, %cst [0] : vector<3x128xf32> to vector<128xf32>
    %9 = vector.shape_cast %8 : vector<128xf32> to vector<1x128xf32>
    %10 = tpu.reciprocal %5 : vector<1x128xf32> -> vector<1x128xf32>
    %11 = arith.mulf %9, %10 : vector<1x128xf32>
    %c0_6 = arith.constant 0 : index
    %c0_7 = arith.constant 0 : index
    %12 = vector.load %arg5[%c0_6, %c0_7] : memref<1x1xf32, #tpu.memory_space<vmem>>, vector<1x1xf32>
    %cst_8 = arith.constant dense<0.000000e+00> : vector<1xf32>
    %13 = vector.multi_reduction <add>, %11, %cst_8 [1] : vector<1x128xf32> to vector<1xf32>
    %14 = vector.shape_cast %13 : vector<1xf32> to vector<1x1xf32>
    %15 = arith.addf %12, %14 : vector<1x1xf32>
    %c0_9 = arith.constant 0 : index
    %c0_10 = arith.constant 0 : index
    %16 = vector.load %arg5[%c0_9, %c0_10] : memref<1x1xf32, #tpu.memory_space<vmem>>, vector<1x1xf32>
    tpu.vector_store %arg5[%c0_9, %c0_10], %15 {strides = array<i32>} : memref<1x1xf32, #tpu.memory_space<vmem>>, vector<1x1xf32>,
    %c0_11 = arith.constant 0 : index
    %c0_12 = arith.constant 0 : index
    %17 = vector.load %arg6[%c0_11, %c0_12] : memref<1x1xf32, #tpu.memory_space<vmem>>, vector<1x1xf32>
    %18 = math.log %5 : vector<1x128xf32>
    %cst_13 = arith.constant dense<0.000000e+00> : vector<1xf32>
    %19 = vector.multi_reduction <add>, %18, %cst_13 [1] : vector<1x128xf32> to vector<1xf32>
    %20 = vector.shape_cast %19 : vector<1xf32> to vector<1x1xf32>
    %21 = arith.addf %17, %20 : vector<1x1xf32>
    %c0_14 = arith.constant 0 : index
    %c0_15 = arith.constant 0 : index
    %22 = vector.load %arg6[%c0_14, %c0_15] : memref<1x1xf32, #tpu.memory_space<vmem>>, vector<1x1xf32>
    tpu.vector_store %arg6[%c0_14, %c0_15], %21 {strides = array<i32>} : memref<1x1xf32, #tpu.memory_space<vmem>>, vector<1x1xf32>,
    %c0_i32_16 = arith.constant 0 : i32
    %23 = arith.cmpi eq, %arg0, %c0_i32_16 : i32
    %24 = arith.extui %23 : i1 to i32
    %c0_i32_17 = arith.constant 0 : i32
    %25 = arith.cmpi ne, %24, %c0_i32_17 : i32
    scf.if %25 {
      %c0_18 = arith.constant 0 : index
      %c0_19 = arith.constant 0 : index
      %26 = vector.load %arg5[%c0_18, %c0_19] : memref<1x1xf32, #tpu.memory_space<vmem>>, vector<1x1xf32>
      %cst_20 = arith.constant 0.020833334 : f32
      %27 = vector.broadcast %cst_20 : f32 to vector<1x1xf32>
      %28 = arith.mulf %26, %27 : vector<1x1xf32>
      %c0_21 = arith.constant 0 : index
      %c0_22 = arith.constant 0 : index
      %29 = vector.load %arg6[%c0_21, %c0_22] : memref<1x1xf32, #tpu.memory_space<vmem>>, vector<1x1xf32>
      %cst_23 = arith.constant 6.250000e-02 : f32
      %30 = vector.broadcast %cst_23 : f32 to vector<1x1xf32>
      %31 = arith.mulf %29, %30 : vector<1x1xf32>
      %32 = arith.addf %28, %31 : vector<1x1xf32>
      %c0_24 = arith.constant 0 : index
      %c0_25 = arith.constant 0 : index
      %33 = vector.load %arg4[%c0_24, %c0_25] : memref<1x1xf32, #tpu.memory_space<vmem>>, vector<1x1xf32>
      tpu.vector_store %arg4[%c0_24, %c0_25], %32 {strides = array<i32>} : memref<1x1xf32, #tpu.memory_space<vmem>>, vector<1x1xf32>,
    } else {
    }
    return
  }
  func.func @transform_0(%arg0: i32) -> (i32, i32) {
    %c0_i32 = arith.constant 0 : i32
    %c0_i32_0 = arith.constant 0 : i32
    return %c0_i32, %arg0 : i32, i32
  }
  func.func @transform_1(%arg0: i32) -> (i32, i32) {
    %c0_i32 = arith.constant 0 : i32
    %c0_i32_0 = arith.constant 0 : i32
    return %c0_i32, %arg0 : i32, i32
  }
  func.func @transform_2(%arg0: i32) -> (i32, i32) {
    %c0_i32 = arith.constant 0 : i32
    %c0_i32_0 = arith.constant 0 : i32
    return %c0_i32, %arg0 : i32, i32
  }
  func.func @transform_3(%arg0: i32) -> (i32, i32) {
    %c0_i32 = arith.constant 0 : i32
    %c0_i32_0 = arith.constant 0 : i32
    %c0_i32_1 = arith.constant 0 : i32
    return %c0_i32, %c0_i32_0 : i32, i32
  }
}

</mosaic_0001>

<bundles_post_ra>
// kernel: tpu_custom_call.1
= control target key start
LH: loop header
LB: loop body
LE: loop exit
PB: predicated region body
PF: predicated region fallthrough
CT: control target
= control target key end

     0   :  { %8 = vsyncpa [#allocation5], 0  ;;  %s250_s0 = inlined_call_operand.hbm [shape: f32[3,128], index: 0, kind: input, shape index: {}]   ;;  %s251_s1 = inlined_call_operand.hbm [shape: f32[3,128], index: 1, kind: input, shape index: {}]   ;;  %s252_s2 = inlined_call_operand.vmem [shape: f32[1,128], index: 2, kind: input, shape index: {}]   ;;  %s253_s3 = inlined_call_operand.hbm [shape: f32[1,1], index: 3, kind: output, shape index: {}]  }
   0x1   :  { %9 = vsyncpa [#allocation8], 0 }
   0x2   :  { %10 = vsyncpa [#allocation6], 0  ;;  %s182_s12 = smov [#allocation4]   ;;  %s183_s14 = smov [#allocation7]  }
   0x3   :  { %s17_s13 = sshll.u32 %s182_s12, 4  ;;  %s27_s15 = sshll.u32 %s183_s14, 4  ;;  %s18_s13 = int_to_ptr.vmem [resolvable:$true] %s17_s13  ;;  %s28_s15 = int_to_ptr.vmem [resolvable:$true] %s27_s15 }
   0x4   :  { %s110_s18 = scalar_lea.hbm %s250_s0, 64 }
   0x5   :  { %p111_p0 = scmp.ne.s32.totalorder %s250_s0, %s110_s18  ;;  %p114_p1 = scmp.lt.u32.totalorder %s110_s18, %s250_s0 }
   0x7   :  { %p116_p2 = pnand %p114_p1, %p111_p0 }
   0x9   :  { %119 = shalt.err (!%p116_p2)
}
   0xa   :  { %s120_s23 = scalar_lea.vmem %s18_s13, 64  ;;  %p125_p4 = scmp.lt.s32.totalorder %s18_s13, %s18_s13 }
   0xb   :  { %p121_p3 = scmp.ne.s32.totalorder %s18_s13, %s120_s23  ;;  %p126_p5 = scmp.lt.s32.totalorder %s120_s23, %s120_s23 }
   0xd   :  { %p127_p6 = por %p126_p5, %p125_p4 }
   0xf   :  { %p128_p7 = pnand %p127_p6, %p121_p3 }
  0x11   :  { %131 = shalt.err (!%p128_p7)
}
  0x12   :  { %20 = dma.hbm_to_vmem [thread:$0]  %s250_s0, 64, %s18_s13, [#allocation5]  }
  0x13   :  { %s132_s28 = scalar_lea.hbm %s251_s1, 64 }
  0x14   :  { %p133_p8 = scmp.ne.s32.totalorder %s251_s1, %s132_s28  ;;  %p136_p9 = scmp.lt.u32.totalorder %s132_s28, %s251_s1 }
  0x16   :  { %p138_p10 = pnand %p136_p9, %p133_p8 }
  0x18   :  { %141 = shalt.err (!%p138_p10)
}
  0x19   :  { %s142_s6 = scalar_lea.vmem %s28_s15, 64  ;;  %p147_p12 = scmp.lt.s32.totalorder %s28_s15, %s28_s15 }
  0x1a   :  { %p143_p11 = scmp.ne.s32.totalorder %s28_s15, %s142_s6  ;;  %p148_p13 = scmp.lt.s32.totalorder %s142_s6, %s142_s6 }
  0x1c   :  { %p149_p0 = por %p148_p13, %p147_p12 }
  0x1e   :  { %p150_p1 = pnand %p149_p0, %p143_p11 }
  0x20   :  { %153 = shalt.err (!%p150_p1)
}
  0x21   :  { %30 = dma.hbm_to_vmem [thread:$0]  %s251_s1, 64, %s28_s15, [#allocation8]  }
  0x22   :  { %176 = dma.done.wait [#allocation5], 64  }
  0x23   :  { %177 = vsyncadd [#allocation5], 4294967232 }
  0x24   :  { %178 = dma.done.wait [#allocation8], 64  }
  0x25   :  { %179 = vsyncadd [#allocation8], 4294967232  ;;  %vm43_vm0 = vcmask 0   ;;  %v184_v0 = vmov 0.0   ;;  %v46_v1 = vld [vmem:[#allocation4] sm:$0x7] }
  0x26   :  { %44 = vst.msk [vmem:[#allocation2] sm:$0x1] %vm43_vm0, %v184_v0  ;;  %45 = vst.msk [vmem:[#allocation3] sm:$0x1] %vm43_vm0, %v184_v0  ;;  %v47_v2 = vld [vmem:[#allocation7] sm:$0x7] }
  0x27   :  { %v48_v3 = vld [vmem:[%s252_s2] sm:$0x1]  ;;  %v49_v4 = vsub.f32 %v46_v1, %v47_v2  ;;  %vm51_vm1 = vcmask 1042432   ;;  %vm62_vm2 = vcmask 1040384   ;;  %s185_s1 = smov [#allocation9]  }
  0x28   :  { %106 = vrcp.f32 %v48_v3  ;;  %s92_s2 = sshll.u32 %s185_s1, 4  ;;  %s93_s2 = int_to_ptr.vmem [resolvable:$true] %s92_s2 }
  0x29   :  { %v50_v5 = vmul.f32 %v49_v4, %v49_v4  ;;  %108 = vlog2.f32 %v48_v3  ;;  %s154_s10 = scalar_lea.vmem %s93_s2, 16  ;;  %s158_s11 = scalar_lea.vmem %s93_s2, 32 }
  0x2a   :  { %p155_p2 = scmp.ne.s32.totalorder %s93_s2, %s154_s10  ;;  %p159_p3 = scmp.lt.s32.totalorder %s93_s2, %s93_s2 }
  0x2b   :  { %v52_v6 = vsel %vm51_vm1, %v50_v5, 0.0  ;;  %p160_p4 = scmp.lt.s32.totalorder %s158_s11, %s154_s10 }
  0x2c   :  { %v53_v7 = vrot.slane %v52_v6, 4 }
  0x2d   :  { %v61_v19 = vld [vmem:[#allocation2] sm:$0x1]  ;;  %v69_v22 = vld [vmem:[#allocation3] sm:$0x1]  ;;  %p161_p5 = por %p160_p4, %p159_p3 }
  0x2e   :  { %v54_v8 = vadd.f32 %v53_v7, %v52_v6 }
  0x2f   :  { %p162_p6 = pnand %p161_p5, %p155_p2 }
  0x30   :  { %v55_v9 = vrot.slane %v54_v8, 2 }
  0x32   :  { %v56_v10 = vadd.f32 %v55_v9, %v54_v8  ;;  %v107_v11 = vpop.eup %106 }
  0x33   :  { %v109_v13 = vpop.eup %108 }
  0x34   :  { %v57_v12 = vrot.slane %v56_v10, 1  ;;  %v71_v16 = vmul.f32 0.6931472, %v109_v13 }
  0x36   :  { %v58_v14 = vadd.f32 %v57_v12, %v56_v10  ;;  %v72_v18 = vsel %vm62_vm2, %v71_v16, 0.0 }
  0x38   :  { %v60_v15 = vmul.f32 %v107_v11, %v58_v14 }
  0x3a   :  { %v63_v17 = vsel %vm62_vm2, %v60_v15, 0.0 }
  0x3b   :  { %64 = vadd.xlane.f32.xlu0 %v63_v17 }
  0x3f   :  { %73 = vadd.xlane.f32.xlu0 %v72_v18 }
  0xc8   :  { %v65_v20 = vpop.xlane.xlu0 %64 }
  0xc9   :  { %v66_v21 = vadd.f32 %v65_v20, %v61_v19 }
  0xcb   :  { %68 = vst.msk [vmem:[#allocation2] sm:$0x1] %vm43_vm0, %v66_v21 }
  0xcc   :  { %v74_v23 = vpop.xlane.xlu0 %73 }
  0xcd   :  { %v75_v24 = vadd.f32 %v74_v23, %v69_v22 }
  0xcf   :  { %76 = vst.msk [vmem:[#allocation3] sm:$0x1] %vm43_vm0, %v75_v24 }
  0xd2   :  { %v80_v25 = vld [vmem:[#allocation2] sm:$0x1] }
  0xd3   :  { %v81_v27 = vmul.f32 0.020833334, %v80_v25 }
  0xd6   :  { %v82_v26 = vld [vmem:[#allocation3] sm:$0x1] }
  0xd7   :  { %v83_v28 = vmul.f32 0.0625, %v82_v26 }
  0xd9   :  { %v84_v29 = vadd.f32 %v83_v28, %v81_v27 }
  0xdb   :  { %85 = vst.msk [vmem:[#allocation9] sm:$0x1] %vm43_vm0, %v84_v29 }
  0xdc   :  { %165 = shalt.err (!%p162_p6)
}
  0xdd   :  { %s166_s14 = scalar_lea.hbm %s253_s3, 16 }
  0xde   :  { %p167_p7 = scmp.ne.s32.totalorder %s253_s3, %s166_s14  ;;  %p170_p8 = scmp.lt.u32.totalorder %s166_s14, %s253_s3 }
  0xe0   :  { %p172_p9 = pnand %p170_p8, %p167_p7 }
  0xe2   :  { %175 = shalt.err (!%p172_p9)
}
  0xe3   :  { %95 = dma.vmem_to_hbm [thread:$0]  %s93_s2, 16, %s253_s3, [#allocation6]  }
  0xe4   :  { %180 = dma.done.wait [#allocation6], 16  }
  0xe5   :  { %181 = vsyncadd [#allocation6], 4294967280 }
  0xe6   :  { %99 = vsyncpa [#allocation5], 1 }
  0xe7   :  { %100 = vsyncpa [#allocation8], 1 }
  0xe8   :  { %101 = vsyncpa [#allocation6], 1 }

</bundles_post_ra>
